<compile_context>
chip_gen: v5e
topology: v5e:2x2
jax: 0.10.0
libtpu: 0.0.40
codegen_flags: <defaults>
</compile_context>

<pallas_src>
import jax
import jax.numpy as jnp
from jax.experimental import pallas as pl
from jax.experimental.pallas import tpu as pltpu

BN_EPS = 1e-5

# bf16 operands give ~2-4x MXU rate on v6e/v7x and halve weight DMA; kept f32
# here so the self-check matches the f32 reference tightly.  Weights are cast
# once in the wrappers (grid-invariant), activations inside _mm.
MATMUL_DTYPE = jnp.float32

# tanh-form GELU (perf review: the erf polynomial over the 4x-expanded MLP
# activation saturates the VALU slot).  PyTorch nn.GELU() is the exact erf
# form; set False to match it bit-for-tolerance (exact path kept below).
GELU_APPROX = True

# Target row tile for the flattened-pixel matmul kernels (1 & 2).
# TODO(synk): raise to 1024 on v5e (128 MiB VMEM, lowest HBM BW); keep <=512
# on v7x (64 MiB VMEM).
TILE_ROWS = 512

# Target output-row tile for the halo-tiled ConvNext-tail kernel.
TILE_H = 32

# Scoped-VMEM budget (default is only 16/32 MiB on v5e/v6e).  Tiles above are
# sized so this also fits v7x's 64 MiB physical VMEM.
VMEM_LIMIT = 64 * 1024 * 1024


def _row_tile(n):
    """Pick a row tile: TILE_ROWS for big problems, else the 8-aligned size."""
    if n >= TILE_ROWS:
        return TILE_ROWS
    return max(8, ((n + 7) // 8) * 8)


def _pad_rows(x, n_padded):
    n = x.shape[0]
    if n_padded != n:
        x = jnp.pad(x, ((0, n_padded - n), (0, 0)))
    return x


# ----------------------------------------------------------------------------
# activations
# ----------------------------------------------------------------------------
def _erf(x):
    # Numerical-Recipes erfc approximation (|err| < 1.2e-7).
    t = 1.0 / (1.0 + 0.5 * jnp.abs(x))
    poly = -1.26551223 + t * (1.00002368 + t * (0.37409196 + t * (0.09678418 +
           t * (-0.18628806 + t * (0.27886807 + t * (-1.13520398 + t * (1.48851587 +
           t * (-0.82215223 + t * 0.17087277))))))))
    y = 1.0 - t * jnp.exp(-x * x + poly)
    return jnp.where(x >= 0, y, -y)


def _gelu_exact(x):
    return 0.5 * x * (1.0 + _erf(x * 0.7071067811865476))


def _gelu(x):
    if GELU_APPROX:
        # 0.5*x*(1+tanh(sqrt(2/pi)*(x+0.044715 x^3))): ~6 VPU ops + 1 EUP tanh
        # vs ~25 VPU ops + 1 EUP exp for the exact-erf polynomial.
        c = 0.7978845608028654
        return 0.5 * x * (1.0 + jnp.tanh(c * (x + 0.044715 * x * x * x)))
    return _gelu_exact(x)


def _sigmoid(x):
    # exp on the EUP + approximate reciprocal on the EUP: keeps the dependent
    # gate -> linear1 -> linear2 chain off the VALU slot.
    return pl.reciprocal(1.0 + jnp.exp(-x), approx=True)


def _mm(a, w):
    """MXU matmul; weights are pre-cast in the wrapper, f32 accumulation."""
    return jnp.dot(a.astype(w.dtype), w, preferred_element_type=jnp.float32)


# ----------------------------------------------------------------------------
# Kernel 1: BatchNorm(x1) + ConvTranspose2d(k=2, s=2) expressed as a matmul
#   out[n, co*4 + ki*2 + kj] = (x*s + t)[n, :] @ W[:, co, ki, kj] + b[co]
# Row-tiled over the flattened pixel axis (padded rows are zeros and are
# sliced off after the call -- they never feed an accumulation).
# ----------------------------------------------------------------------------
def _bn_matmul_kernel(x_ref, s_ref, t_ref, w_ref, b_ref, o_ref):
    xb = x_ref[...] * s_ref[...] + t_ref[...]                       # (tile, Cin)
    o_ref[...] = _mm(xb, w_ref[...]) + b_ref[...]


def bn_upconv(x1_nhwc, bn_scale, bn_shift, w_up, b_up):
    B, H1, W1, Cin = x1_nhwc.shape
    Cout = w_up.shape[1]
    N = B * H1 * W1
    tile = _row_tile(N)
    Np = pl.cdiv(N, tile) * tile
    xf = _pad_rows(x1_nhwc.reshape(N, Cin), Np)

    w2d = w_up.reshape(Cin, Cout * 4).astype(MATMUL_DTYPE)
    bias = jnp.broadcast_to(b_up[:, None, None], (Cout, 2, 2)).reshape(1, Cout * 4)

    row = lambda i: (i, 0)
    full = lambda i: (0, 0)
    out = pl.pallas_call(
        _bn_matmul_kernel,
        out_shape=jax.ShapeDtypeStruct((Np, Cout * 4), jnp.float32),
        grid=(Np // tile,),
        in_specs=[
            pl.BlockSpec((tile, Cin), row),
            pl.BlockSpec((1, Cin), full),
            pl.BlockSpec((1, Cin), full),
            pl.BlockSpec((Cin, Cout * 4), full),
            pl.BlockSpec((1, Cout * 4), full),
        ],
        out_specs=pl.BlockSpec((tile, Cout * 4), row),
        compiler_params=pltpu.CompilerParams(
            dimension_semantics=("parallel",), vmem_limit_bytes=VMEM_LIMIT),
    )(xf, bn_scale.reshape(1, Cin), bn_shift.reshape(1, Cin), w2d, bias)

    # TODO(synk): fold this pixel-shuffle (and the zero pad below) into the
    # consumer (strided index_map from the (B,H1,W1,2,2,C) layout) to remove
    # two HBM round-trips of x1u -- biggest relative gain on v5e.
    out = out[:N].reshape(B, H1, W1, Cout, 2, 2)
    out = out.transpose(0, 1, 4, 2, 5, 3).reshape(B, 2 * H1, 2 * W1, Cout)
    return out


# ----------------------------------------------------------------------------
# Kernel 2: fused gate / linear1 / linear2 / conv1x1(concat) on (N, C) tiles
#   g1,g2,g3 = split(x1 @ Wg + bg)        (single 3C-wide MXU push)
#   x2' = sigmoid(lin1(g1+x2)) * x2 + sigmoid(g2)*tanh(g3)
#   out = lin2(x2') @ Wc[:C] + x1 @ Wc[C:] + bc     (cat order: [x2', x1])
# ----------------------------------------------------------------------------
def _gate_fuse_kernel(x1_ref, x2_ref, wg_ref, bg_ref, w1_ref, b1_ref,
                      w2_ref, b2_ref, wc1_ref, wc2_ref, bc_ref, o_ref):
    x1 = x1_ref[...]
    x2 = x2_ref[...]
    C = x2.shape[1]
    # Independent skip matmul (the LLO scheduler overlaps it regardless of
    # statement order; the real lever is the cheap EUP sigmoid below).
    skip = _mm(x1, wc2_ref[...])
    g = _mm(x1, wg_ref[...]) + bg_ref[...]
    g1, g2, g3 = g[:, :C], g[:, C:2 * C], g[:, 2 * C:]
    h = _mm(g1 + x2, w1_ref[...]) + b1_ref[...]
    x2n = _sigmoid(h) * x2 + _sigmoid(g2) * jnp.tanh(g3)
    y = _mm(x2n, w2_ref[...]) + b2_ref[...]
    o_ref[...] = _mm(y, wc1_ref[...]) + skip + bc_ref[...]


def gate_fuse(x1_nhwc, x2_nhwc, wg, bg, w1, b1, w2, b2, wc, bc):
    B, H, W, C = x1_nhwc.shape
    Cout = wc.shape[1]
    N = B * H * W
    tile = _row_tile(N)
    Np = pl.cdiv(N, tile) * tile
    x1f = _pad_rows(x1_nhwc.reshape(N, C), Np)
    x2f = _pad_rows(x2_nhwc.reshape(N, C), Np)

    wg = wg.astype(MATMUL_DTYPE)
    w1 = w1.astype(MATMUL_DTYPE)
    w2 = w2.astype(MATMUL_DTYPE)
    wc = wc.astype(MATMUL_DTYPE)

    row = lambda i: (i, 0)
    full = lambda i: (0, 0)
    # TODO(synk): single-buffer the grid-invariant weight blocks with
    # pipeline_mode=pl.Buffered(1) to halve their VMEM footprint on v7x.
    out = pl.pallas_call(
        _gate_fuse_kernel,
        out_shape=jax.ShapeDtypeStruct((Np, Cout), jnp.float32),
        grid=(Np // tile,),
        in_specs=[
            pl.BlockSpec((tile, C), row), pl.BlockSpec((tile, C), row),
            pl.BlockSpec((C, 3 * C), full), pl.BlockSpec((1, 3 * C), full),
            pl.BlockSpec((C, C), full), pl.BlockSpec((1, C), full),
            pl.BlockSpec((C, C), full), pl.BlockSpec((1, C), full),
            pl.BlockSpec((C, Cout), full), pl.BlockSpec((C, Cout), full),
            pl.BlockSpec((1, Cout), full),
        ],
        out_specs=pl.BlockSpec((tile, Cout), row),
        compiler_params=pltpu.CompilerParams(
            dimension_semantics=("parallel",), vmem_limit_bytes=VMEM_LIMIT),
    )(x1f, x2f, wg, bg.reshape(1, 3 * C), w1, b1.reshape(1, C),
      w2, b2.reshape(1, C), wc[:C], wc[C:], bc.reshape(1, Cout))
    return out[:N].reshape(B, H, W, Cout)


# ----------------------------------------------------------------------------
# Kernel 3 (fused ConvNext tail), halo row-tiled over (batch, H-row-tiles):
#   h   = dwconv7x7(reflect-pad(y)) * s1 + t1          (BN1 + dw bias folded)
#   z   = GELU(h @ W1 + b1)
#   o   = GELU( y + (z @ W2 + b2) * s2 + t2 )          (BN2 + residual GELU)
# The main operand carries th rows of the reflect-padded image; a second 8-row
# operand on the SAME array supplies the 6 bottom halo rows, so VMEM per step
# stays a few row-blocks and the grid pipelines/parallelises over (B, rows).
# ----------------------------------------------------------------------------
def _cnext_tail_kernel(xm_ref, xh_ref, wdw_ref, s1_ref, t1_ref, w1_ref, b1_ref,
                       w2_ref, b2_ref, s2_ref, t2_ref, o_ref):
    th, W, D = o_ref.shape
    # Stitch the 6 halo rows below the main row block (leading-dim concat).
    xp = jnp.concatenate([xm_ref[...], xh_ref[0:6]], axis=0)   # (>=th+6, Wp, D)
    wdw = wdw_ref[...]                                          # (7, 7, D)

    acc = jnp.zeros((th, W, D), jnp.float32)
    res = None
    # 7 sublane (kj) shifts, each reused across all 7 ki taps; the ki slices
    # are leading-dim address offsets (free).  Was 49 unaligned relayouts.
    # TODO(synk): move the kj shift onto the XLU with pltpu.roll instead of a
    # sliced relayout copy.
    for kj in range(7):
        xs = xp[:, kj:kj + W, :]                                # (rows, W, D)
        if kj == 3:
            res = xs[3:3 + th]       # residual = centre of the padded tile
        for ki in range(7):
            acc = acc + xs[ki:ki + th] * wdw[ki, kj][None, None, :]

    h = acc * s1_ref[0][None, None, :] + t1_ref[0][None, None, :]

    # TODO(synk): at production channel counts pad D to a lane multiple (128)
    # so this reshape is a free re-view and the output store is unmasked vst.
    hf = h.reshape(th * W, D)
    z = _gelu(_mm(hf, w1_ref[...]) + b1_ref[...])
    y2 = _mm(z, w2_ref[...]) + b2_ref[...]
    y2 = y2 * s2_ref[...] + t2_ref[...]
    o_ref[...] = _gelu(res.reshape(th * W, D) + y2).reshape(th, W, D)


def _pick_tile_h(H):
    """Largest multiple-of-8 divisor of H that is <= TILE_H (None => no halo
    tiling; fall back to one full-height block per batch element)."""
    if H % 8 != 0:
        return None
    for cand in range(TILE_H, 7, -8):
        if H % cand == 0:
            return cand
    return None


def cnext_block(y_nhwc, w_dw, dw_scale, dw_shift, w1, b1, w2, b2, s2, t2):
    B, H, W, D = y_nhwc.shape
    Dh = w1.shape[1]
    # Reflect padding matches the PyTorch dwconv (padding_mode='reflect').
    # TODO(synk): fold the reflect pad into the kernel (row DMA with reflected
    # indices + in-kernel column reflect) to drop this extra HBM round trip.
    xp = jnp.pad(y_nhwc, ((0, 0), (3, 3), (3, 3), (0, 0)), mode="reflect")
    Wp = W + 6

    th = _pick_tile_h(H)
    if th is None:
        # Degenerate fallback (H not a multiple of 8): one full-height block.
        th, n_row, main_h = H, 1, H + 6
        halo_map = lambda b, r: (b, 0, 0, 0)
    else:
        n_row, main_h = H // th, th
        # 2 junk rows so the 8-row halo block after the last tile is in bounds
        # (the kernel only ever reads the first 6 rows of the halo block).
        xp = jnp.pad(xp, ((0, 0), (0, 2), (0, 0), (0, 0)))
        halo_map = lambda b, r: (b, ((r + 1) * th) // 8, 0, 0)

    w1 = w1.astype(MATMUL_DTYPE)
    w2 = w2.astype(MATMUL_DTYPE)
    full2 = lambda b, r: (0, 0)
    # TODO(synk): single-buffer the grid-invariant weight blocks
    # (pipeline_mode=pl.Buffered(1)) -- matters for pw1/pw2 at large D on v7x.
    return pl.pallas_call(
        _cnext_tail_kernel,
        out_shape=jax.ShapeDtypeStruct((B, H, W, D), jnp.float32),
        grid=(B, n_row),
        in_specs=[
            pl.BlockSpec((None, main_h, Wp, D), lambda b, r: (b, r, 0, 0)),
            pl.BlockSpec((None, 8, Wp, D), halo_map),
            pl.BlockSpec((7, 7, D), lambda b, r: (0, 0, 0)),
            pl.BlockSpec((1, D), full2),
            pl.BlockSpec((1, D), full2),
            pl.BlockSpec((D, Dh), full2),
            pl.BlockSpec((1, Dh), full2),
            pl.BlockSpec((Dh, D), full2),
            pl.BlockSpec((1, D), full2),
            pl.BlockSpec((1, D), full2),
            pl.BlockSpec((1, D), full2),
        ],
        out_specs=pl.BlockSpec((None, th, W, D), lambda b, r: (b, r, 0, 0)),
        compiler_params=pltpu.CompilerParams(
            dimension_semantics=("parallel", "parallel"),
            vmem_limit_bytes=VMEM_LIMIT),
    )(xp, xp, w_dw, dw_scale.reshape(1, D), dw_shift.reshape(1, D),
      w1, b1.reshape(1, Dh), w2, b2.reshape(1, D),
      s2.reshape(1, D), t2.reshape(1, D))


# ----------------------------------------------------------------------------
# Full ConvNextUpblock forward (NCHW in, NCHW out, like PyTorch)
# ----------------------------------------------------------------------------
def convnext_upblock_forward(p, x1_nchw, x2_nchw):
    x1 = jnp.transpose(x1_nchw, (0, 2, 3, 1))     # -> NHWC
    x2 = jnp.transpose(x2_nchw, (0, 2, 3, 1))

    # self.norm (BN, eval mode) folded into an affine applied inside kernel 1
    s0 = p["bn0_gamma"] / jnp.sqrt(p["bn0_rv"] + BN_EPS)
    t0 = p["bn0_beta"] - p["bn0_rm"] * s0
    x1u = bn_upconv(x1, s0, t0, p["up_w"], p["up_b"])          # (B, 2H1, 2W1, C)

    # F.pad to match x2 spatial size (zero pad)
    dy = x2.shape[1] - x1u.shape[1]
    dx = x2.shape[2] - x1u.shape[2]
    if dy or dx:
        x1u = jnp.pad(x1u, ((0, 0), (dy // 2, dy - dy // 2),
                            (dx // 2, dx - dx // 2), (0, 0)))

    # gate / linear1 / linear2 / conv1x1(concat([x2', x1])) fused
    y = gate_fuse(x1u, x2, p["gate_w"], p["gate_b"], p["lin1_w"], p["lin1_b"],
                  p["lin2_w"], p["lin2_b"], p["c1x1_w"], p["c1x1_b"])

    # ConvNextBlock tail: dwconv + BN1 + MLP + BN2 + residual GELU, one kernel.
    s1 = p["bn1_gamma"] / jnp.sqrt(p["bn1_rv"] + BN_EPS)
    t1 = p["bn1_beta"] - p["bn1_rm"] * s1
    dw_scale = s1
    dw_shift = p["dw_b"] * s1 + t1            # fold dwconv bias into BN affine
    s2 = p["bn2_gamma"] / jnp.sqrt(p["bn2_rv"] + BN_EPS)
    t2 = p["bn2_beta"] - p["bn2_rm"] * s2
    out = cnext_block(y, p["dw_w"], dw_scale, dw_shift,
                      p["pw1_w"], p["pw1_b"], p["pw2_w"], p["pw2_b"], s2, t2)

    return jnp.transpose(out, (0, 3, 1, 2))   # -> NCHW


# ----------------------------------------------------------------------------
# Pure-JAX reference (same math, no Pallas) for a correctness check
# ----------------------------------------------------------------------------
def _reference_forward(p, x1_nchw, x2_nchw):
    x1 = jnp.transpose(x1_nchw, (0, 2, 3, 1))
    x2 = jnp.transpose(x2_nchw, (0, 2, 3, 1))
    s0 = p["bn0_gamma"] / jnp.sqrt(p["bn0_rv"] + BN_EPS)
    t0 = p["bn0_beta"] - p["bn0_rm"] * s0
    xb = x1 * s0 + t0
    B, H1, W1, _ = xb.shape
    Cout = p["up_w"].shape[1]
    up = jnp.einsum("bhwc,cokl->bhkwlo", xb, p["up_w"])
    up = up.reshape(B, 2 * H1, 2 * W1, Cout) + p["up_b"]
    dy = x2.shape[1] - up.shape[1]
    dx = x2.shape[2] - up.shape[2]
    x1p = jnp.pad(up, ((0, 0), (dy // 2, dy - dy // 2),
                       (dx // 2, dx - dx // 2), (0, 0)))
    C = x2.shape[-1]
    g = x1p @ p["gate_w"] + p["gate_b"]
    g1, g2, g3 = g[..., :C], g[..., C:2 * C], g[..., 2 * C:]
    x2n = (jax.nn.sigmoid((g1 + x2) @ p["lin1_w"] + p["lin1_b"]) * x2
           + jax.nn.sigmoid(g2) * jnp.tanh(g3))
    x2n = x2n @ p["lin2_w"] + p["lin2_b"]
    y = jnp.concatenate([x2n, x1p], axis=-1) @ p["c1x1_w"] + p["c1x1_b"]
    # ConvNextBlock
    H, W, D = y.shape[1], y.shape[2], y.shape[3]
    xp = jnp.pad(y, ((0, 0), (3, 3), (3, 3), (0, 0)), mode="reflect")
    acc = jnp.zeros_like(y)
    for ki in range(7):
        for kj in range(7):
            acc = acc + xp[:, ki:ki + H, kj:kj + W, :] * p["dw_w"][ki, kj]
    s1 = p["bn1_gamma"] / jnp.sqrt(p["bn1_rv"] + BN_EPS)
    t1 = p["bn1_beta"] - p["bn1_rm"] * s1
    h = (acc + p["dw_b"]) * s1 + t1
    # GELU flavour matches the kernel's flag (PyTorch nn.GELU() == exact erf;
    # set GELU_APPROX=False above to verify the exact-erf path).
    z = jax.nn.gelu(h @ p["pw1_w"] + p["pw1_b"], approximate=GELU_APPROX)
    yy = z @ p["pw2_w"] + p["pw2_b"]
    s2 = p["bn2_gamma"] / jnp.sqrt(p["bn2_rv"] + BN_EPS)
    t2 = p["bn2_beta"] - p["bn2_rm"] * s2
    yy = yy * s2 + t2
    out = jax.nn.gelu(y + yy, approximate=GELU_APPROX)
    return jnp.transpose(out, (0, 3, 1, 2))


# ----------------------------------------------------------------------------
# Deterministic parameter init (shapes from the module's __init__)
# ----------------------------------------------------------------------------
def init_params(key, block):
    c0, c2 = block[0], block[2]
    C = c0 // 2
    keys = jax.random.split(key, 32)
    it = iter(range(32))
    n = lambda shape, s=0.1: s * jax.random.normal(keys[next(it)], shape, jnp.float32)
    u = lambda shape: 1.0 + 0.1 * jax.random.uniform(keys[next(it)], shape, jnp.float32)
    p = {}
    p["bn0_gamma"], p["bn0_beta"] = 1.0 + n((c0,)), n((c0,))
    p["bn0_rm"], p["bn0_rv"] = n((c0,)), u((c0,))
    p["up_w"], p["up_b"] = n((c0, C, 2, 2)), n((C,))       # ConvTranspose2d (Cin,Cout,2,2)
    p["gate_w"], p["gate_b"] = n((C, 3 * C)), n((3 * C,))
    p["lin1_w"], p["lin1_b"] = n((C, C)), n((C,))
    p["lin2_w"], p["lin2_b"] = n((C, C)), n((C,))
    p["c1x1_w"], p["c1x1_b"] = n((2 * C, c2)), n((c2,))    # Conv2d 1x1 as (Cin, Cout)
    p["dw_w"], p["dw_b"] = n((7, 7, c2)), n((c2,))         # depthwise 7x7, per-channel
    p["bn1_gamma"], p["bn1_beta"] = 1.0 + n((c2,)), n((c2,))
    p["bn1_rm"], p["bn1_rv"] = n((c2,)), u((c2,))
    p["pw1_w"], p["pw1_b"] = n((c2, 4 * c2)), n((4 * c2,))
    p["pw2_w"], p["pw2_b"] = n((4 * c2, c2)), n((c2,))
    p["bn2_gamma"], p["bn2_beta"] = 1.0 + n((c2,)), n((c2,))
    p["bn2_rm"], p["bn2_rv"] = n((c2,)), u((c2,))
    return p


if __name__ == "__main__":
    # TODO(synk): with tiny channel counts like this toy config (C=4, c2=8) the
    # lane dim is <<128; production channel counts >=128 get full lane/MXU use.
    block = (8, 16, 8)            # block[0]=8 -> C=4, block[2]=8
    key = jax.random.PRNGKey(0)
    kp, k1, k2 = jax.random.split(key, 3)
    params = init_params(kp, block)

    B = 2
    x1 = jax.random.normal(k1, (B, block[0], 8, 8), jnp.float32)          # NCHW
    x2 = jax.random.normal(k2, (B, block[0] // 2, 16, 16), jnp.float32)   # NCHW

    out = convnext_upblock_forward(params, x1, x2)
    jax.block_until_ready(out)
    assert out.shape == (B, block[2], 16, 16), out.shape
    assert bool(jnp.all(jnp.isfinite(out)))

    ref = _reference_forward(params, x1, x2)
    max_err = float(jnp.max(jnp.abs(out - ref)))
    # Small slack over 1e-3 for the EUP approximate-reciprocal sigmoid.
    assert max_err < 2e-3, f"mismatch vs reference: {max_err}"

    print("KERNEL_OK")
</pallas_src>

<mosaic_0001>
module attributes {stable_mosaic.version = 11 : i64} {
  func.func @_bn_matmul_kernel(%arg0: i32, %arg1: memref<128x8xf32, #tpu.memory_space<vmem>>, %arg2: memref<1x8xf32, #tpu.memory_space<vmem>>, %arg3: memref<1x8xf32, #tpu.memory_space<vmem>>, %arg4: memref<8x16xf32, #tpu.memory_space<vmem>>, %arg5: memref<1x16xf32, #tpu.memory_space<vmem>>, %arg6: memref<128x16xf32, #tpu.memory_space<vmem>>) attributes {dimension_semantics = [#tpu.dimension_semantics<parallel>], iteration_bounds = array<i64: 1>, scalar_prefetch = 0 : i64, scratch_operands = 0 : i64, tpu.core_type = #tpu.core_type<tc>, window_params = [{transform_indices = @transform_0, window_bounds = array<i64: 128, 8>}, {pipeline_mode = #tpu.pipeline_mode<synchronous>, transform_indices = @transform_1, window_bounds = array<i64: 1, 8>}, {pipeline_mode = #tpu.pipeline_mode<synchronous>, transform_indices = @transform_2, window_bounds = array<i64: 1, 8>}, {pipeline_mode = #tpu.pipeline_mode<synchronous>, transform_indices = @transform_3, window_bounds = array<i64: 8, 16>}, {pipeline_mode = #tpu.pipeline_mode<synchronous>, transform_indices = @transform_4, window_bounds = array<i64: 1, 16>}, {transform_indices = @transform_5, window_bounds = array<i64: 128, 16>}]} {
    %c0 = arith.constant 0 : index
    %c0_0 = arith.constant 0 : index
    %0 = vector.load %arg1[%c0, %c0_0] : memref<128x8xf32, #tpu.memory_space<vmem>>, vector<128x8xf32>
    %c0_1 = arith.constant 0 : index
    %c0_2 = arith.constant 0 : index
    %1 = vector.load %arg2[%c0_1, %c0_2] : memref<1x8xf32, #tpu.memory_space<vmem>>, vector<1x8xf32>
    %2 = vector.broadcast %1 : vector<1x8xf32> to vector<128x8xf32>
    %3 = arith.mulf %0, %2 : vector<128x8xf32>
    %c0_3 = arith.constant 0 : index
    %c0_4 = arith.constant 0 : index
    %4 = vector.load %arg3[%c0_3, %c0_4] : memref<1x8xf32, #tpu.memory_space<vmem>>, vector<1x8xf32>
    %5 = vector.broadcast %4 : vector<1x8xf32> to vector<128x8xf32>
    %6 = arith.addf %3, %5 : vector<128x8xf32>
    %c0_5 = arith.constant 0 : index
    %c0_6 = arith.constant 0 : index
    %7 = vector.load %arg4[%c0_5, %c0_6] : memref<8x16xf32, #tpu.memory_space<vmem>>, vector<8x16xf32>
    %cst = arith.constant dense<0.000000e+00> : vector<128x16xf32>
    %8 = tpu.matmul %6, %7, %cst {dimension_numbers = #tpu.dot_dimension_numbers<[1], [0], [0], [1], [0, 0, 1, 1], [], []>} : vector<128x8xf32>, vector<8x16xf32>, vector<128x16xf32> -> vector<128x16xf32>
    %c0_7 = arith.constant 0 : index
    %c0_8 = arith.constant 0 : index
    %9 = vector.load %arg5[%c0_7, %c0_8] : memref<1x16xf32, #tpu.memory_space<vmem>>, vector<1x16xf32>
    %10 = vector.broadcast %9 : vector<1x16xf32> to vector<128x16xf32>
    %11 = arith.addf %8, %10 : vector<128x16xf32>
    %c0_9 = arith.constant 0 : index
    %c0_10 = arith.constant 0 : index
    %12 = vector.load %arg6[%c0_9, %c0_10] : memref<128x16xf32, #tpu.memory_space<vmem>>, vector<128x16xf32>
    tpu.vector_store %arg6[%c0_9, %c0_10], %11 {strides = array<i32>} : memref<128x16xf32, #tpu.memory_space<vmem>>, vector<128x16xf32>,
    return
  }
  func.func @transform_0(%arg0: i32) -> (i32, i32) {
    %c0_i32 = arith.constant 0 : i32
    %c0_i32_0 = arith.constant 0 : i32
    return %arg0, %c0_i32 : i32, i32
  }
  func.func @transform_1(%arg0: i32) -> (i32, i32) {
    %c0_i32 = arith.constant 0 : i32
    %c0_i32_0 = arith.constant 0 : i32
    %c0_i32_1 = arith.constant 0 : i32
    return %c0_i32, %c0_i32_0 : i32, i32
  }
  func.func @transform_2(%arg0: i32) -> (i32, i32) {
    %c0_i32 = arith.constant 0 : i32
    %c0_i32_0 = arith.constant 0 : i32
    %c0_i32_1 = arith.constant 0 : i32
    return %c0_i32, %c0_i32_0 : i32, i32
  }
  func.func @transform_3(%arg0: i32) -> (i32, i32) {
    %c0_i32 = arith.constant 0 : i32
    %c0_i32_0 = arith.constant 0 : i32
    %c0_i32_1 = arith.constant 0 : i32
    return %c0_i32, %c0_i32_0 : i32, i32
  }
  func.func @transform_4(%arg0: i32) -> (i32, i32) {
    %c0_i32 = arith.constant 0 : i32
    %c0_i32_0 = arith.constant 0 : i32
    %c0_i32_1 = arith.constant 0 : i32
    return %c0_i32, %c0_i32_0 : i32, i32
  }
  func.func @transform_5(%arg0: i32) -> (i32, i32) {
    %c0_i32 = arith.constant 0 : i32
    %c0_i32_0 = arith.constant 0 : i32
    return %arg0, %c0_i32 : i32, i32
  }
}

</mosaic_0001>

<bundles_post_ra>
// kernel: tpu_custom_call.1
= control target key start
LH: loop header
LB: loop body
LE: loop exit
PB: predicated region body
PF: predicated region fallthrough
CT: control target
= control target key end

     0   :  { %vm81_vm0 = vcmask 64512   ;;  %vm195_vm1 = vcmask 130048   ;;  %s426_s3 = inlined_call_operand.vmem [shape: f32[8,16], index: 3, kind: input, shape index: {}]   ;;  %s427_s0 = inlined_call_operand.vmem [shape: f32[128,8], index: 0, kind: input, shape index: {}]   ;;  %s428_s1 = inlined_call_operand.vmem [shape: f32[1,8], index: 1, kind: input, shape index: {}]   ;;  %s429_s2 = inlined_call_operand.vmem [shape: f32[1,8], index: 2, kind: input, shape index: {}]   ;;  %s430_s4 = inlined_call_operand.vmem [shape: f32[1,16], index: 4, kind: input, shape index: {}]   ;;  %s431_s5 = inlined_call_operand.vmem [shape: f32[128,16], index: 5, kind: output, shape index: {}]  }
   0x1   :  { %v76_v0 = vld [vmem:[%s426_s3] sm:$0xff]  ;;  %v29_v11 = vld [vmem:[%s427_s0 + $0x48] sm:$0xff]  ;;  %v30_v27 = vld [vmem:[%s427_s0 + $0x50] sm:$0xff] }
   0x2   :  { %v28_v1 = vld [vmem:[%s427_s0 + $0x40] sm:$0xff]  ;;  %233 = vmatpush.msra.mxu2 %v76_v0  ;;  %234 = vmatpush.msra.mxu3 %v76_v0  ;;  %v33_v12 = vld [vmem:[%s427_s0 + $0x68] sm:$0xff]  ;;  %v34_v28 = vld [vmem:[%s427_s0 + $0x70] sm:$0xff] }
   0x3   :  { %v235_v2 = vld [vmem:[%s428_s1] ss:$0 sm:$0xff]  ;;  %145 = vmatpush.msra.mxu0 %v76_v0  ;;  %232 = vmatpush.msra.mxu1 %v76_v0  ;;  %v21_v17 = vld [vmem:[%s427_s0 + $0x8] sm:$0xff]  ;;  %v22_v29 = vld [vmem:[%s427_s0 + $0x10] sm:$0xff] }
   0x4   :  { %v280_v3 = vld [vmem:[%s429_s2] ss:$0 sm:$0xff]  ;;  %v48_v7 = vmul.f32 %v235_v2, %v28_v1  ;;  %v25_v18 = vld [vmem:[%s427_s0 + $0x28] sm:$0xff]  ;;  %v49_v19 = vmul.f32 %v235_v2, %v29_v11  ;;  %v53_v20 = vmul.f32 %v235_v2, %v33_v12  ;;  %v41_v21 = vmul.f32 %v235_v2, %v21_v17  ;;  %v26_v30 = vld [vmem:[%s427_s0 + $0x30] sm:$0xff] }
   0x5   :  { %v32_v4 = vld [vmem:[%s427_s0 + $0x60] sm:$0xff]  ;;  %v45_v22 = vmul.f32 %v235_v2, %v25_v18  ;;  %v50_v31 = vmul.f32 %v235_v2, %v30_v27  ;;  %v54_v32 = vmul.f32 %v235_v2, %v34_v28  ;;  %v42_v33 = vmul.f32 %v235_v2, %v22_v29  ;;  %v31_v39 = vld [vmem:[%s427_s0 + $0x58] sm:$0xff] }
   0x6   :  { %v20_v5 = vld [vmem:[%s427_s0] sm:$0xff]  ;;  %v52_v8 = vmul.f32 %v235_v2, %v32_v4  ;;  %v68_v13 = vadd.f32 %v280_v3, %v48_v7  ;;  %v69_v23 = vadd.f32 %v280_v3, %v49_v19  ;;  %v73_v24 = vadd.f32 %v280_v3, %v53_v20  ;;  %v35_v40 = vld [vmem:[%s427_s0 + $0x78] sm:$0xff] }
   0x7   :  { %v24_v6 = vld [vmem:[%s427_s0 + $0x20] sm:$0xff]  ;;  %v40_v9 = vmul.f32 %v235_v2, %v20_v5  ;;  %v61_v25 = vadd.f32 %v280_v3, %v41_v21  ;;  %v65_v26 = vadd.f32 %v280_v3, %v45_v22  ;;  %v46_v34 = vmul.f32 %v235_v2, %v26_v30  ;;  %v23_v41 = vld [vmem:[%s427_s0 + $0x18] sm:$0xff] }
   0x8   :  { %v44_v10 = vmul.f32 %v235_v2, %v24_v6  ;;  %v72_v14 = vadd.f32 %v280_v3, %v52_v8  ;;  %224 = vmatmul.msk.f32.vlgmr.msra.gmra.mxu2 %vm81_vm0, %v68_v13  ;;  %v70_v35 = vadd.f32 %v280_v3, %v50_v31  ;;  %v74_v36 = vadd.f32 %v280_v3, %v54_v32  ;;  %v27_v42 = vld [vmem:[%s427_s0 + $0x38] sm:$0xff]  ;;  %v237_v51 = vld [vmem:[%s430_s4] ss:$0 sm:$0xff] }
   0x9   :  { %v60_v15 = vadd.f32 %v280_v3, %v40_v9  ;;  %v62_v37 = vadd.f32 %v280_v3, %v42_v33  ;;  %v66_v38 = vadd.f32 %v280_v3, %v46_v34  ;;  %v51_v43 = vmul.f32 %v235_v2, %v31_v39 }
   0xa   :  { %v64_v16 = vadd.f32 %v280_v3, %v44_v10  ;;  %228 = vmatmul.msk.f32.vlgmr.msra.gmra.mxu3 %vm81_vm0, %v72_v14  ;;  %v55_v44 = vmul.f32 %v235_v2, %v35_v40  ;;  %v43_v45 = vmul.f32 %v235_v2, %v23_v41  ;;  %v47_v46 = vmul.f32 %v235_v2, %v27_v42 }
   0xb   :  { %216 = vmatmul.msk.f32.vlgmr.msra.gmra.mxu0 %vm81_vm0, %v60_v15  ;;  %v71_v47 = vadd.f32 %v280_v3, %v51_v43 }
   0xc   :  { %220 = vmatmul.msk.f32.vlgmr.msra.gmra.mxu1 %vm81_vm0, %v64_v16  ;;  %v75_v48 = vadd.f32 %v280_v3, %v55_v44  ;;  %v63_v49 = vadd.f32 %v280_v3, %v43_v45  ;;  %v67_v50 = vadd.f32 %v280_v3, %v47_v46 }
  0x10   :  { %225 = vmatmul.msk.f32.gmra.mxu2 %vm81_vm0, %v69_v23 }
  0x12   :  { %229 = vmatmul.msk.f32.gmra.mxu3 %vm81_vm0, %v73_v24 }
  0x13   :  { %217 = vmatmul.msk.f32.gmra.mxu0 %vm81_vm0, %v61_v25 }
  0x14   :  { %221 = vmatmul.msk.f32.gmra.mxu1 %vm81_vm0, %v65_v26 }
  0x18   :  { %226 = vmatmul.msk.f32.gmra.mxu2 %vm81_vm0, %v70_v35 }
  0x1a   :  { %230 = vmatmul.msk.f32.gmra.mxu3 %vm81_vm0, %v74_v36 }
  0x1b   :  { %218 = vmatmul.msk.f32.gmra.mxu0 %vm81_vm0, %v62_v37 }
  0x1c   :  { %222 = vmatmul.msk.f32.gmra.mxu1 %vm81_vm0, %v66_v38 }
  0x20   :  { %227 = vmatmul.msk.f32.gmra.mxu2 %vm81_vm0, %v71_v47 }
  0x22   :  { %231 = vmatmul.msk.f32.gmra.mxu3 %vm81_vm0, %v75_v48 }
  0x23   :  { %219 = vmatmul.msk.f32.gmra.mxu0 %vm81_vm0, %v63_v49 }
  0x24   :  { %223 = vmatmul.msk.f32.gmra.mxu1 %vm81_vm0, %v67_v50 }
  0x88   :  { %v147_v52 = vpop.f32.mrf.mxu0 }
  0x89   :  { %v159_v53 = vpop.f32.mrf.mxu1  ;;  %v148_v54 = vadd.f32 %v237_v51, %v147_v52 }
  0x8a   :  { %v160_v55 = vadd.f32 %v237_v51, %v159_v53 }
  0x8b   :  { %196 = vst.msk [vmem:[%s431_s5] sm:$0xff] %vm195_vm1, %v148_v54  ;;  %v171_v56 = vpop.f32.mrf.mxu2 }
  0x8c   :  { %200 = vst.msk [vmem:[%s431_s5 + $0x20] sm:$0xff] %vm195_vm1, %v160_v55  ;;  %v172_v58 = vadd.f32 %v237_v51, %v171_v56 }
  0x8d   :  { %v183_v57 = vpop.f32.mrf.mxu3 }
  0x8e   :  { %v184_v59 = vadd.f32 %v237_v51, %v183_v57  ;;  %204 = vst.msk [vmem:[%s431_s5 + $0x40] sm:$0xff] %vm195_vm1, %v172_v58 }
  0x90   :  { %v150_v60 = vpop.f32.mrf.mxu0  ;;  %208 = vst.msk [vmem:[%s431_s5 + $0x60] sm:$0xff] %vm195_vm1, %v184_v59 }
  0x91   :  { %v162_v61 = vpop.f32.mrf.mxu1  ;;  %v151_v62 = vadd.f32 %v237_v51, %v150_v60 }
  0x92   :  { %v163_v63 = vadd.f32 %v237_v51, %v162_v61 }
  0x93   :  { %197 = vst.msk [vmem:[%s431_s5 + $0x8] sm:$0xff] %vm195_vm1, %v151_v62  ;;  %v174_v0 = vpop.f32.mrf.mxu2 }
  0x94   :  { %201 = vst.msk [vmem:[%s431_s5 + $0x28] sm:$0xff] %vm195_vm1, %v163_v63  ;;  %v175_v2 = vadd.f32 %v237_v51, %v174_v0 }
  0x95   :  { %v186_v1 = vpop.f32.mrf.mxu3 }
  0x96   :  { %v187_v3 = vadd.f32 %v237_v51, %v186_v1  ;;  %205 = vst.msk [vmem:[%s431_s5 + $0x48] sm:$0xff] %vm195_vm1, %v175_v2 }
  0x98   :  { %v153_v4 = vpop.f32.mrf.mxu0  ;;  %209 = vst.msk [vmem:[%s431_s5 + $0x68] sm:$0xff] %vm195_vm1, %v187_v3 }
  0x99   :  { %v165_v5 = vpop.f32.mrf.mxu1  ;;  %v154_v6 = vadd.f32 %v237_v51, %v153_v4 }
  0x9a   :  { %v166_v7 = vadd.f32 %v237_v51, %v165_v5 }
  0x9b   :  { %198 = vst.msk [vmem:[%s431_s5 + $0x10] sm:$0xff] %vm195_vm1, %v154_v6  ;;  %v177_v8 = vpop.f32.mrf.mxu2 }
  0x9c   :  { %202 = vst.msk [vmem:[%s431_s5 + $0x30] sm:$0xff] %vm195_vm1, %v166_v7  ;;  %v178_v10 = vadd.f32 %v237_v51, %v177_v8 }
  0x9d   :  { %v189_v9 = vpop.f32.mrf.mxu3 }
  0x9e   :  { %v190_v11 = vadd.f32 %v237_v51, %v189_v9  ;;  %206 = vst.msk [vmem:[%s431_s5 + $0x50] sm:$0xff] %vm195_vm1, %v178_v10 }
  0xa0   :  { %v156_v12 = vpop.f32.mrf.mxu0  ;;  %210 = vst.msk [vmem:[%s431_s5 + $0x70] sm:$0xff] %vm195_vm1, %v190_v11 }
  0xa1   :  { %v168_v13 = vpop.f32.mrf.mxu1  ;;  %v157_v14 = vadd.f32 %v237_v51, %v156_v12 }
  0xa2   :  { %v169_v15 = vadd.f32 %v237_v51, %v168_v13 }
  0xa3   :  { %199 = vst.msk [vmem:[%s431_s5 + $0x18] sm:$0xff] %vm195_vm1, %v157_v14  ;;  %v180_v16 = vpop.f32.mrf.mxu2 }
  0xa4   :  { %203 = vst.msk [vmem:[%s431_s5 + $0x38] sm:$0xff] %vm195_vm1, %v169_v15  ;;  %v181_v18 = vadd.f32 %v237_v51, %v180_v16 }
  0xa5   :  { %v192_v17 = vpop.f32.mrf.mxu3 }
  0xa6   :  { %v193_v19 = vadd.f32 %v237_v51, %v192_v17  ;;  %207 = vst.msk [vmem:[%s431_s5 + $0x58] sm:$0xff] %vm195_vm1, %v181_v18 }
  0xa8   :  { %211 = vst.msk [vmem:[%s431_s5 + $0x78] sm:$0xff] %vm195_vm1, %v193_v19 }

</bundles_post_ra>
